<compile_context>
chip_gen: v7x
topology: tpu7x:2x2x1
jax: 0.10.0
libtpu: 0.0.40
codegen_flags: <defaults>
</compile_context>

<pallas_src>
import functools
import numpy as np
import jax
import jax.numpy as jnp
from jax.experimental import pallas as pl
from jax.experimental.pallas import tpu as pltpu

LANES = 128          # lane-dense output width (multiple of 128)
NEG = -1e30          # finite "-inf" stand-in for masked softmax lanes
ROW_TILE_MAX = 1024  # node-row tile upper bound (amortizes ~0.35 us/step)


def _round_up(x, m):
    return (x + m - 1) // m * m


def _vmem_limit_bytes():
    # Conservative default assumes v7x (64 MiB physical VMEM); raised to
    # 64 MiB if the device reports more (v5e/v6e have 128 MiB; the explicit
    # limit is load-bearing on v5e whose scoped default is only 16 MiB).
    cap = 64 << 20
    try:
        info = pltpu.get_tpu_info()
        cap = int(getattr(info, "vmem_capacity_bytes", cap)) or cap
    except Exception:
        pass
    return min(64 << 20, (cap * 3) // 4)


def _pick_row_tile(n_rows, hidden, budget_bytes):
    """Largest node-row tile (multiple of 8) whose working set fits VMEM."""
    tn = min(ROW_TILE_MAX, _round_up(n_rows, 8))

    def est(t):
        # Pipelined blocks (double-buffered): x + mut (f32), aa-label and
        # target_static (lane-padded to 128 in VMEM), slab output.
        io = 2 * t * hidden * 4 + 2 * t * LANES * 4 + t * LANES * 4
        # f32 temporaries: slab / aa_z / exp / picked-mask + (t, H) diff.
        tmp = 4 * t * LANES * 4 + t * hidden * 4
        return 2 * io + tmp

    while tn > 8 and est(tn) > budget_bytes:
        tn = max(8, _round_up(tn // 2, 8))
    return tn


# ----------------------------------------------------------------------------
# Fused decoder kernel: aa|statics heads + effect head + three losses.
# grid = (B, N_tiles); batch axis "parallel", node-tile axis "arbitrary".
# Scalar-prefetch arg 0: per-batch effect label (SMEM).
# ----------------------------------------------------------------------------
def _decoder_kernel(tlab_ref, x_ref, mut_ref, lab_ref, tstat_ref,
                    w_aast_ref, b_aast_ref, w_ef_ref, b_ef_ref,
                    slab_ref, ef_ref, loss_ref, pooled_scr,
                    *, c_aa, c_st, c_ef, n_rows, row_tile):
    b = pl.program_id(0)
    n = pl.program_id(1)
    nt = pl.num_programs(1)

    x = x_ref[...]                       # (tn, H) f32
    mut = mut_ref[...]                   # (tn, H) f32

    # Row-validity mask computed in-kernel (no HBM mask input).
    row = n * row_tile + jax.lax.broadcasted_iota(jnp.int32, (row_tile, 1), 0)
    valid = row < n_rows                 # (tn, 1) bool

    # --- aa|statics heads: one lane-dense MXU matmul (bf16 in, f32 acc) -----
    slab = (jnp.dot(x.astype(jnp.bfloat16), w_aast_ref[...],
                    preferred_element_type=jnp.float32)
            + b_aast_ref[...])           # (tn, LANES) f32, [statics | aa | 0]
    slab_ref[...] = slab

    lane = jax.lax.broadcasted_iota(jnp.int32, (row_tile, LANES), 1)

    # --- aa cross-entropy partial: sum over valid rows of (lse - picked) ----
    aa_mask = (lane >= c_st) & (lane < c_st + c_aa)
    aa_z = jnp.where(aa_mask, slab, NEG)
    m = jnp.max(aa_z, axis=-1, keepdims=True)
    lse = jnp.log(jnp.sum(jnp.exp(aa_z - m), axis=-1, keepdims=True)) + m
    lab = lab_ref[...]                   # (tn, 1) int32 aa labels
    picked = jnp.sum(jnp.where(lane == lab + c_st, slab, 0.0),
                     axis=-1, keepdims=True)
    aa_part = jnp.sum(jnp.where(valid, lse - picked, 0.0))

    # --- statics MSE partial (statics live in lanes [0, c_st)) --------------
    d = jnp.where(valid, slab[:, :c_st] - tstat_ref[...], 0.0)
    mse_part = jnp.sum(d * d)

    # --- running per-batch pooled max of (mut - x) for the effect head ------
    diff = jnp.where(valid, mut - x, NEG)
    tile_max = jnp.max(diff, axis=0, keepdims=True)        # (1, H)

    @pl.when(n == 0)
    def _():
        pooled_scr[...] = jnp.full_like(pooled_scr, NEG)
        loss_ref[...] = jnp.zeros_like(loss_ref)

    pooled_scr[...] = jnp.maximum(pooled_scr[...], tile_max)

    lane1 = jax.lax.broadcasted_iota(jnp.int32, (1, LANES), 1)
    loss_ref[...] += (jnp.where(lane1 == 0, aa_part, 0.0)
                      + jnp.where(lane1 == 1, mse_part, 0.0))

    # --- last node tile of this batch: effect head + its CE term ------------
    @pl.when(n == nt - 1)
    def _():
        pooled = pooled_scr[...]                            # (1, H) f32
        ef = (jnp.dot(pooled.astype(jnp.bfloat16), w_ef_ref[...],
                      preferred_element_type=jnp.float32)
              + b_ef_ref[...])                              # (1, LANES)
        ef_ref[...] = ef
        ef_z = jnp.where(lane1 < c_ef, ef, NEG)
        me = jnp.max(ef_z, axis=-1, keepdims=True)
        lse_e = jnp.log(jnp.sum(jnp.exp(ef_z - me), axis=-1, keepdims=True)) + me
        tlab = tlab_ref[b]                                  # effect label (SMEM)
        picked_e = jnp.sum(jnp.where(lane1 == tlab, ef, 0.0),
                           axis=-1, keepdims=True)
        loss_ref[...] += jnp.where(lane1 == 2, jnp.sum(lse_e - picked_e), 0.0)


def fused_decoder(params, x, mut, aa_labels, target_static, target_label,
                  c_aa, c_st, c_ef):
    B, N, H = x.shape
    assert c_aa + c_st <= LANES and c_ef <= LANES

    vmem_limit = _vmem_limit_bytes()
    tn = _pick_row_tile(N, H, budget_bytes=int(vmem_limit * 0.75))
    n_pad = _round_up(N, tn)

    def pad_nodes(a):
        if n_pad == N:
            return a
        pad = [(0, 0), (0, n_pad - N)] + [(0, 0)] * (a.ndim - 2)
        return jnp.pad(a, pad)

    # x / mut streamed in f32 (bf16 cast happens in-kernel just before the
    # MXU): avoids the extra wrapper cast pass over the two largest tensors.
    xp = pad_nodes(x.astype(jnp.float32))
    mp = pad_nodes(mut.astype(jnp.float32))
    lab_p = pad_nodes(aa_labels.astype(jnp.int32)[..., None])   # (B, n_pad, 1)
    tstat_p = pad_nodes(target_static.astype(jnp.float32))      # (B, n_pad, c_st)

    # Concatenated, lane-padded head weights: [statics | aa | zero-pad].
    w_aast = jnp.zeros((H, LANES), jnp.float32)
    w_aast = w_aast.at[:, :c_st].set(params["wst"])
    w_aast = w_aast.at[:, c_st:c_st + c_aa].set(params["waa"])
    b_aast = jnp.zeros((1, LANES), jnp.float32)
    b_aast = b_aast.at[0, :c_st].set(params["bst"])
    b_aast = b_aast.at[0, c_st:c_st + c_aa].set(params["baa"])
    w_ef = jnp.zeros((H, LANES), jnp.float32).at[:, :c_ef].set(params["wef"])
    b_ef = jnp.zeros((1, LANES), jnp.float32).at[0, :c_ef].set(params["bef"])

    kernel = functools.partial(_decoder_kernel, c_aa=c_aa, c_st=c_st,
                               c_ef=c_ef, n_rows=N, row_tile=tn)
    grid = (B, n_pad // tn)

    # TODO(synk): if B can be 1 on v7x, emit per-node-tile partial outputs
    # (reduce in the wrapper) so the node axis can also be "parallel" for the
    # second TensorCore; with the per-batch accumulators below it must stay
    # "arbitrary".
    grid_spec = pltpu.PrefetchScalarGridSpec(
        num_scalar_prefetch=1,
        grid=grid,
        in_specs=[
            pl.BlockSpec((None, tn, H), lambda b, n, tl: (b, n, 0)),     # x
            pl.BlockSpec((None, tn, H), lambda b, n, tl: (b, n, 0)),     # mut
            pl.BlockSpec((None, tn, 1), lambda b, n, tl: (b, n, 0)),     # aa labels
            pl.BlockSpec((None, tn, c_st), lambda b, n, tl: (b, n, 0)),  # target_static
            pl.BlockSpec((H, LANES), lambda b, n, tl: (0, 0)),           # w (st|aa), resident
            pl.BlockSpec((1, LANES), lambda b, n, tl: (0, 0)),           # b (st|aa)
            pl.BlockSpec((H, LANES), lambda b, n, tl: (0, 0)),           # w effect
            pl.BlockSpec((1, LANES), lambda b, n, tl: (0, 0)),           # b effect
        ],
        out_specs=(
            pl.BlockSpec((None, tn, LANES), lambda b, n, tl: (b, n, 0)),
            pl.BlockSpec((None, 1, LANES), lambda b, n, tl: (b, 0, 0)),
            pl.BlockSpec((None, 1, LANES), lambda b, n, tl: (b, 0, 0)),
        ),
        scratch_shapes=[pltpu.VMEM((1, H), jnp.float32)],                # pooled max
    )

    slab, ef_pad, loss_part = pl.pallas_call(
        kernel,
        out_shape=(
            jax.ShapeDtypeStruct((B, n_pad, LANES), jnp.float32),   # [st|aa] slab
            jax.ShapeDtypeStruct((B, 1, LANES), jnp.float32),       # effect logits
            jax.ShapeDtypeStruct((B, 1, LANES), jnp.float32),       # loss partials
        ),
        grid_spec=grid_spec,
        compiler_params=pltpu.CompilerParams(
            dimension_semantics=("parallel", "arbitrary"),
            vmem_limit_bytes=vmem_limit),
    )(target_label.astype(jnp.int32), xp, mp, lab_p, tstat_p,
      w_aast.astype(jnp.bfloat16), b_aast,
      w_ef.astype(jnp.bfloat16), b_ef)

    return slab, ef_pad, loss_part


# ----------------------------------------------------------------------------
# BertGNNDecoder forward (Pallas-backed, fully on-device, jittable)
# ----------------------------------------------------------------------------
def bert_gnn_decoder_forward(params, batch_node_feats, batch_mut_node_feats,
                             dilat_res2d_output, batch, num_bins):
    c_aa = params["waa"].shape[1]
    c_st = params["wst"].shape[1]
    c_ef = params["wef"].shape[1]
    B, N, _ = batch_node_feats.shape

    aa_labels = jnp.argmax(batch["seq"], axis=-1).astype(jnp.int32)   # (B, N)

    slab, ef_pad, loss_part = fused_decoder(
        params, batch_node_feats, batch_mut_node_feats, aa_labels,
        batch["target_static"], batch["target_label"], c_aa, c_st, c_ef)

    aa_out = slab[:, :N, c_st:c_st + c_aa]
    statics_out = slab[:, :N, :c_st]
    effect_out = ef_pad[:, 0, :c_ef]

    lp = loss_part[:, 0, :]                     # (B, LANES)
    aa_loss = jnp.sum(lp[:, 0]) / (B * N)
    statics_loss = jnp.sum(lp[:, 1]) / (B * N * c_st)
    effect_loss = jnp.sum(lp[:, 2]) / B

    edge_attr = batch["edge_attr"]
    if edge_attr.size == 0:
        dist_loss = jnp.zeros((), jnp.float32)
        return (aa_out, statics_out, effect_out, dilat_res2d_output,
                aa_loss, statics_loss, effect_loss, dist_loss)

    # On-device per-graph edge gather: stable argsort by graph id reproduces
    # the torch per-graph grouping order; bins-last transpose makes each
    # edge's num_bins values a contiguous read.
    edge_index = batch["edge_index"].astype(jnp.int32)
    bel = batch["batch_edge_labels"].astype(jnp.int32)
    order = jnp.argsort(bel, stable=True)
    g = bel[order]
    src = edge_index[0, order]
    dst = edge_index[1, order]
    dilat_t = jnp.transpose(dilat_res2d_output, (0, 2, 3, 1))     # (B, N, N, bins)
    gathered = dilat_t[g, src, dst, :]                            # (E, num_bins)
    # Faithful to torch: cat along the bin dim then .view(-1, num_bins).
    predicted = jnp.transpose(gathered).reshape(-1, num_bins)
    labels = edge_attr.reshape(-1).astype(jnp.int32)

    # Distance-bin CE in plain XLA (num_bins << 128 lanes; a Pallas launch is
    # pure overhead at small E per the perf review).
    logp = jax.nn.log_softmax(predicted.astype(jnp.float32), axis=-1)
    dist_loss = -jnp.mean(jnp.take_along_axis(logp, labels[:, None], axis=-1))

    return (aa_out, statics_out, effect_out, dilat_res2d_output,
            aa_loss, statics_loss, effect_loss, dist_loss)


# ----------------------------------------------------------------------------
# Pure-JAX reference (same bf16-quantized matmul inputs, f32 accumulation,
# f32 pooled diff) for correctness checks.
# ----------------------------------------------------------------------------
def _ce_ref(logits, labels):
    logp = jax.nn.log_softmax(logits.astype(jnp.float32), axis=-1)
    picked = jnp.take_along_axis(logp, labels.astype(jnp.int32)[:, None], axis=-1)
    return -jnp.mean(picked)


def reference_forward(params, x, mut, dilat, batch, num_bins):
    f32 = jnp.float32
    B, N, H = x.shape
    x2 = x.reshape(-1, H).astype(jnp.bfloat16)
    aa = (jnp.dot(x2, params["waa"].astype(jnp.bfloat16),
                  preferred_element_type=f32).reshape(B, N, -1) + params["baa"])
    st = (jnp.dot(x2, params["wst"].astype(jnp.bfloat16),
                  preferred_element_type=f32).reshape(B, N, -1) + params["bst"])
    pooled = jnp.max(mut - x, axis=1)
    ef = (jnp.dot(pooled.astype(jnp.bfloat16), params["wef"].astype(jnp.bfloat16),
                  preferred_element_type=f32) + params["bef"])

    tseq = jnp.argmax(batch["seq"], axis=-1).reshape(-1)
    aa_loss = _ce_ref(aa.reshape(-1, aa.shape[-1]), tseq)
    st_loss = jnp.mean((st - batch["target_static"]) ** 2)
    ef_loss = _ce_ref(ef, batch["target_label"])

    edge_index = np.asarray(batch["edge_index"])
    edge_attr = np.asarray(batch["edge_attr"])
    bel = np.asarray(batch["batch_edge_labels"])
    dilat_np = np.asarray(dilat)
    preds = []
    for i in range(dilat_np.shape[0]):
        cur = edge_index[:, bel == i]
        preds.append(dilat_np[i][:, cur[0], cur[1]])
    predicted = jnp.asarray(np.concatenate(preds, axis=1)).reshape(-1, num_bins)
    dist_loss = _ce_ref(predicted, jnp.asarray(edge_attr).reshape(-1))
    return aa, st, ef, aa_loss, st_loss, ef_loss, dist_loss


# ----------------------------------------------------------------------------
# Main
# ----------------------------------------------------------------------------
if __name__ == "__main__":
    B, N, H = 2, 8, 32
    C_AA, C_ST, C_EF, NUM_BINS = 20, 4, 3, 8

    key = jax.random.PRNGKey(0)
    ks = jax.random.split(key, 12)

    def linear_params(kw, kb, in_f, out_f):
        bound = 1.0 / np.sqrt(in_f)
        w = jax.random.uniform(kw, (in_f, out_f), jnp.float32, -bound, bound)
        b = jax.random.uniform(kb, (out_f,), jnp.float32, -bound, bound)
        return w, b

    waa, baa = linear_params(ks[0], ks[1], H, C_AA)
    wst, bst = linear_params(ks[2], ks[3], H, C_ST)
    wef, bef = linear_params(ks[4], ks[5], H, C_EF)
    params = dict(waa=waa, baa=baa, wst=wst, bst=bst, wef=wef, bef=bef)

    batch_node_feats = jax.random.normal(ks[6], (B, N, H), jnp.float32)
    batch_mut_node_feats = jax.random.normal(ks[7], (B, N, H), jnp.float32)
    dilat_res2d_output = jax.random.normal(ks[8], (B, NUM_BINS, N, N), jnp.float32)

    seq_labels = jax.random.randint(ks[9], (B, N), 0, C_AA)
    seq = jax.nn.one_hot(seq_labels, C_AA, dtype=jnp.float32)
    target_static = jax.random.normal(ks[10], (B, N, C_ST), jnp.float32)
    target_label = jax.random.randint(ks[11], (B,), 0, C_EF)

    rng = np.random.default_rng(0)
    E_per = 6
    E = B * E_per
    edge_index = np.stack([rng.integers(0, N, size=(E,)),
                           rng.integers(0, N, size=(E,))]).astype(np.int32)
    batch_edge_labels = np.repeat(np.arange(B), E_per).astype(np.int32)
    edge_attr = rng.integers(0, NUM_BINS, size=(E, 1)).astype(np.int32)

    batch = dict(seq=seq, target_static=target_static, target_label=target_label,
                 edge_index=jnp.asarray(edge_index),
                 edge_attr=jnp.asarray(edge_attr),
                 batch_edge_labels=jnp.asarray(batch_edge_labels))

    fwd = jax.jit(bert_gnn_decoder_forward, static_argnames=("num_bins",))
    outs = fwd(params, batch_node_feats, batch_mut_node_feats,
               dilat_res2d_output, batch, num_bins=NUM_BINS)
    outs = jax.block_until_ready(outs)
    (aa_out, statics_out, effect_out, dilat_out,
     aa_loss, statics_loss, effect_loss, dist_loss) = outs

    ref = reference_forward(params, batch_node_feats, batch_mut_node_feats,
                            dilat_res2d_output, batch, NUM_BINS)
    ref = jax.block_until_ready(ref)
    r_aa, r_st, r_ef, r_aal, r_stl, r_efl, r_dl = ref
    tol = dict(rtol=1e-4, atol=1e-4)
    np.testing.assert_allclose(np.asarray(aa_out), np.asarray(r_aa), **tol)
    np.testing.assert_allclose(np.asarray(statics_out), np.asarray(r_st), **tol)
    np.testing.assert_allclose(np.asarray(effect_out), np.asarray(r_ef), **tol)
    np.testing.assert_allclose(float(aa_loss), float(r_aal), **tol)
    np.testing.assert_allclose(float(statics_loss), float(r_stl), **tol)
    np.testing.assert_allclose(float(effect_loss), float(r_efl), **tol)
    np.testing.assert_allclose(float(dist_loss), float(r_dl), **tol)
    np.testing.assert_allclose(np.asarray(dilat_out),
                               np.asarray(dilat_res2d_output), rtol=0, atol=0)

    print("KERNEL_OK")
</pallas_src>

<mosaic_0001>
module attributes {stable_mosaic.version = 11 : i64} {
  func.func @_decoder_kernel(%arg0: i32, %arg1: i32, %arg2: memref<2xi32, #tpu.memory_space<smem>>, %arg3: memref<1x8x32xf32, #tpu.memory_space<vmem>>, %arg4: memref<1x8x32xf32, #tpu.memory_space<vmem>>, %arg5: memref<1x8x1xi32, #tpu.memory_space<vmem>>, %arg6: memref<1x8x4xf32, #tpu.memory_space<vmem>>, %arg7: memref<32x128xbf16, #tpu.memory_space<vmem>>, %arg8: memref<1x128xf32, #tpu.memory_space<vmem>>, %arg9: memref<32x128xbf16, #tpu.memory_space<vmem>>, %arg10: memref<1x128xf32, #tpu.memory_space<vmem>>, %arg11: memref<1x8x128xf32, #tpu.memory_space<vmem>>, %arg12: memref<1x1x128xf32, #tpu.memory_space<vmem>>, %arg13: memref<1x1x128xf32, #tpu.memory_space<vmem>>, %arg14: memref<1x32xf32, #tpu.memory_space<vmem>>) attributes {dimension_semantics = [#tpu.dimension_semantics<parallel>, #tpu.dimension_semantics<arbitrary>], iteration_bounds = array<i64: 2, 1>, scalar_prefetch = 1 : i64, scratch_operands = 1 : i64, tpu.core_type = #tpu.core_type<tc>, window_params = [{transform_indices = @transform_0, window_bounds = array<i64: 1, 8, 32>}, {transform_indices = @transform_1, window_bounds = array<i64: 1, 8, 32>}, {transform_indices = @transform_2, window_bounds = array<i64: 1, 8, 1>}, {transform_indices = @transform_3, window_bounds = array<i64: 1, 8, 4>}, {pipeline_mode = #tpu.pipeline_mode<synchronous>, transform_indices = @transform_4, window_bounds = array<i64: 32, 128>}, {pipeline_mode = #tpu.pipeline_mode<synchronous>, transform_indices = @transform_5, window_bounds = array<i64: 1, 128>}, {pipeline_mode = #tpu.pipeline_mode<synchronous>, transform_indices = @transform_6, window_bounds = array<i64: 32, 128>}, {pipeline_mode = #tpu.pipeline_mode<synchronous>, transform_indices = @transform_7, window_bounds = array<i64: 1, 128>}, {transform_indices = @transform_8, window_bounds = array<i64: 1, 8, 128>}, {transform_indices = @transform_9, window_bounds = array<i64: 1, 1, 128>}, {transform_indices = @transform_10, window_bounds = array<i64: 1, 1, 128>}]} {
    %c0 = arith.constant 0 : index
    %c0_0 = arith.constant 0 : index
    %c0_1 = arith.constant 0 : index
    %0 = vector.load %arg3[%c0, %c0_0, %c0_1] : memref<1x8x32xf32, #tpu.memory_space<vmem>>, vector<1x8x32xf32>
    %1 = vector.shape_cast %0 : vector<1x8x32xf32> to vector<8x32xf32>
    %c0_2 = arith.constant 0 : index
    %c0_3 = arith.constant 0 : index
    %c0_4 = arith.constant 0 : index
    %2 = vector.load %arg4[%c0_2, %c0_3, %c0_4] : memref<1x8x32xf32, #tpu.memory_space<vmem>>, vector<1x8x32xf32>
    %3 = vector.shape_cast %2 : vector<1x8x32xf32> to vector<8x32xf32>
    %c8_i32 = arith.constant 8 : i32
    %4 = arith.muli %arg1, %c8_i32 : i32
    %5 = tpu.iota {dimensions = array<i32: 0>} : vector<8x1xi32>
    %6 = vector.broadcast %4 : i32 to vector<8x1xi32>
    %7 = arith.addi %6, %5 : vector<8x1xi32>
    %c8_i32_5 = arith.constant 8 : i32
    %8 = vector.broadcast %c8_i32_5 : i32 to vector<8x1xi32>
    %9 = arith.cmpi slt, %7, %8 : vector<8x1xi32>
    %10 = arith.truncf %1 : vector<8x32xf32> to vector<8x32xbf16>
    %c0_6 = arith.constant 0 : index
    %c0_7 = arith.constant 0 : index
    %11 = vector.load %arg7[%c0_6, %c0_7] : memref<32x128xbf16, #tpu.memory_space<vmem>>, vector<32x128xbf16>
    %cst = arith.constant dense<0.000000e+00> : vector<8x128xf32>
    %12 = tpu.matmul %10, %11, %cst {dimension_numbers = #tpu.dot_dimension_numbers<[1], [0], [0], [1], [0, 0, 1, 1], [], []>} : vector<8x32xbf16>, vector<32x128xbf16>, vector<8x128xf32> -> vector<8x128xf32>
    %c0_8 = arith.constant 0 : index
    %c0_9 = arith.constant 0 : index
    %13 = vector.load %arg8[%c0_8, %c0_9] : memref<1x128xf32, #tpu.memory_space<vmem>>, vector<1x128xf32>
    %14 = vector.broadcast %13 : vector<1x128xf32> to vector<8x128xf32>
    %15 = arith.addf %12, %14 : vector<8x128xf32>
    %c0_10 = arith.constant 0 : index
    %c0_11 = arith.constant 0 : index
    %c0_12 = arith.constant 0 : index
    %16 = vector.load %arg11[%c0_10, %c0_11, %c0_12] : memref<1x8x128xf32, #tpu.memory_space<vmem>>, vector<1x8x128xf32>
    %17 = vector.shape_cast %16 : vector<1x8x128xf32> to vector<8x128xf32>
    %18 = vector.shape_cast %15 : vector<8x128xf32> to vector<1x8x128xf32>
    tpu.vector_store %arg11[%c0_10, %c0_11, %c0_12], %18 {strides = array<i32>} : memref<1x8x128xf32, #tpu.memory_space<vmem>>, vector<1x8x128xf32>,
    %19 = tpu.iota {dimensions = array<i32: 1>} : vector<8x128xi32>
    %c4_i32 = arith.constant 4 : i32
    %20 = vector.broadcast %c4_i32 : i32 to vector<8x128xi32>
    %21 = arith.cmpi sge, %19, %20 : vector<8x128xi32>
    %c24_i32 = arith.constant 24 : i32
    %22 = vector.broadcast %c24_i32 : i32 to vector<8x128xi32>
    %23 = arith.cmpi slt, %19, %22 : vector<8x128xi32>
    %24 = arith.andi %21, %23 : vector<8x128xi1>
    %cst_13 = arith.constant -1.000000e+30 : f32
    %25 = vector.broadcast %cst_13 : f32 to vector<8x128xf32>
    %26 = arith.select %24, %15, %25 : vector<8x128xi1>, vector<8x128xf32>
    %cst_14 = arith.constant dense<0xFF800000> : vector<8xf32>
    %27 = vector.multi_reduction <maximumf>, %26, %cst_14 [1] : vector<8x128xf32> to vector<8xf32>
    %28 = vector.shape_cast %27 : vector<8xf32> to vector<8x1xf32>
    %29 = vector.broadcast %28 : vector<8x1xf32> to vector<8x128xf32>
    %30 = arith.subf %26, %29 : vector<8x128xf32>
    %31 = math.exp %30 : vector<8x128xf32>
    %cst_15 = arith.constant dense<0.000000e+00> : vector<8xf32>
    %32 = vector.multi_reduction <add>, %31, %cst_15 [1] : vector<8x128xf32> to vector<8xf32>
    %33 = vector.shape_cast %32 : vector<8xf32> to vector<8x1xf32>
    %34 = math.log %33 : vector<8x1xf32>
    %35 = arith.addf %34, %28 : vector<8x1xf32>
    %c0_16 = arith.constant 0 : index
    %c0_17 = arith.constant 0 : index
    %c0_18 = arith.constant 0 : index
    %36 = vector.load %arg5[%c0_16, %c0_17, %c0_18] : memref<1x8x1xi32, #tpu.memory_space<vmem>>, vector<1x8x1xi32>
    %37 = vector.shape_cast %36 : vector<1x8x1xi32> to vector<8x1xi32>
    %c4_i32_19 = arith.constant 4 : i32
    %38 = vector.broadcast %c4_i32_19 : i32 to vector<8x1xi32>
    %39 = arith.addi %37, %38 : vector<8x1xi32>
    %40 = vector.broadcast %39 : vector<8x1xi32> to vector<8x128xi32>
    %41 = arith.cmpi eq, %19, %40 : vector<8x128xi32>
    %cst_20 = arith.constant 0.000000e+00 : f32
    %42 = vector.broadcast %cst_20 : f32 to vector<8x128xf32>
    %43 = arith.select %41, %15, %42 : vector<8x128xi1>, vector<8x128xf32>
    %cst_21 = arith.constant dense<0.000000e+00> : vector<8xf32>
    %44 = vector.multi_reduction <add>, %43, %cst_21 [1] : vector<8x128xf32> to vector<8xf32>
    %45 = vector.shape_cast %44 : vector<8xf32> to vector<8x1xf32>
    %46 = arith.subf %35, %45 : vector<8x1xf32>
    %cst_22 = arith.constant 0.000000e+00 : f32
    %47 = vector.broadcast %cst_22 : f32 to vector<8x1xf32>
    %48 = arith.select %9, %46, %47 : vector<8x1xi1>, vector<8x1xf32>
    %49 = vector.shape_cast %48 : vector<8x1xf32> to vector<1x8x1xf32>
    %cst_23 = arith.constant dense<0.000000e+00> : vector<1xf32>
    %50 = vector.multi_reduction <add>, %49, %cst_23 [1, 2] : vector<1x8x1xf32> to vector<1xf32>
    %51 = vector.shape_cast %50 : vector<1xf32> to vector<1x1x1xf32>
    %52 = vector.extract %51[0, 0, 0] : f32 from vector<1x1x1xf32>
    %53 = vector.extract_strided_slice %15 {offsets = [0, 0], sizes = [8, 4], strides = [1, 1]} : vector<8x128xf32> to vector<8x4xf32>
    %c0_24 = arith.constant 0 : index
    %c0_25 = arith.constant 0 : index
    %c0_26 = arith.constant 0 : index
    %54 = vector.load %arg6[%c0_24, %c0_25, %c0_26] : memref<1x8x4xf32, #tpu.memory_space<vmem>>, vector<1x8x4xf32>
    %55 = vector.shape_cast %54 : vector<1x8x4xf32> to vector<8x4xf32>
    %56 = arith.subf %53, %55 : vector<8x4xf32>
    %cst_27 = arith.constant 0.000000e+00 : f32
    %57 = vector.shape_cast %9 : vector<8x1xi1> to vector<8x1xi1>
    %58 = vector.broadcast %57 : vector<8x1xi1> to vector<8x4xi1>
    %59 = vector.broadcast %cst_27 : f32 to vector<8x4xf32>
    %60 = arith.select %58, %56, %59 : vector<8x4xi1>, vector<8x4xf32>
    %61 = arith.mulf %60, %60 : vector<8x4xf32>
    %62 = vector.shape_cast %61 : vector<8x4xf32> to vector<1x8x4xf32>
    %cst_28 = arith.constant dense<0.000000e+00> : vector<1xf32>
    %63 = vector.multi_reduction <add>, %62, %cst_28 [1, 2] : vector<1x8x4xf32> to vector<1xf32>
    %64 = vector.shape_cast %63 : vector<1xf32> to vector<1x1x1xf32>
    %65 = vector.extract %64[0, 0, 0] : f32 from vector<1x1x1xf32>
    %66 = arith.subf %3, %1 : vector<8x32xf32>
    %cst_29 = arith.constant -1.000000e+30 : f32
    %67 = vector.shape_cast %9 : vector<8x1xi1> to vector<8x1xi1>
    %68 = vector.broadcast %67 : vector<8x1xi1> to vector<8x32xi1>
    %69 = vector.broadcast %cst_29 : f32 to vector<8x32xf32>
    %70 = arith.select %68, %66, %69 : vector<8x32xi1>, vector<8x32xf32>
    %cst_30 = arith.constant dense<0xFF800000> : vector<32xf32>
    %71 = vector.multi_reduction <maximumf>, %70, %cst_30 [0] : vector<8x32xf32> to vector<32xf32>
    %72 = vector.shape_cast %71 : vector<32xf32> to vector<1x32xf32>
    %c0_i32 = arith.constant 0 : i32
    %73 = arith.cmpi eq, %arg1, %c0_i32 : i32
    %74 = arith.extui %73 : i1 to i32
    %c0_i32_31 = arith.constant 0 : i32
    %75 = arith.cmpi ne, %74, %c0_i32_31 : i32
    scf.if %75 {
      %cst_47 = arith.constant -1.000000e+30 : f32
      %100 = vector.broadcast %cst_47 : f32 to vector<1x32xf32>
      %c0_48 = arith.constant 0 : index
      %c0_49 = arith.constant 0 : index
      %101 = vector.load %arg14[%c0_48, %c0_49] : memref<1x32xf32, #tpu.memory_space<vmem>>, vector<1x32xf32>
      tpu.vector_store %arg14[%c0_48, %c0_49], %100 {strides = array<i32>} : memref<1x32xf32, #tpu.memory_space<vmem>>, vector<1x32xf32>,
      %cst_50 = arith.constant 0.000000e+00 : f32
      %102 = vector.broadcast %cst_50 : f32 to vector<1x128xf32>
      %c0_51 = arith.constant 0 : index
      %c0_52 = arith.constant 0 : index
      %c0_53 = arith.constant 0 : index
      %103 = vector.load %arg13[%c0_51, %c0_52, %c0_53] : memref<1x1x128xf32, #tpu.memory_space<vmem>>, vector<1x1x128xf32>
      %104 = vector.shape_cast %103 : vector<1x1x128xf32> to vector<1x128xf32>
      %105 = vector.shape_cast %102 : vector<1x128xf32> to vector<1x1x128xf32>
      tpu.vector_store %arg13[%c0_51, %c0_52, %c0_53], %105 {strides = array<i32>} : memref<1x1x128xf32, #tpu.memory_space<vmem>>, vector<1x1x128xf32>,
    } else {
    }
    %c0_32 = arith.constant 0 : index
    %c0_33 = arith.constant 0 : index
    %76 = vector.load %arg14[%c0_32, %c0_33] : memref<1x32xf32, #tpu.memory_space<vmem>>, vector<1x32xf32>
    %77 = arith.maximumf %76, %72 : vector<1x32xf32>
    %c0_34 = arith.constant 0 : index
    %c0_35 = arith.constant 0 : index
    %78 = vector.load %arg14[%c0_34, %c0_35] : memref<1x32xf32, #tpu.memory_space<vmem>>, vector<1x32xf32>
    tpu.vector_store %arg14[%c0_34, %c0_35], %77 {strides = array<i32>} : memref<1x32xf32, #tpu.memory_space<vmem>>, vector<1x32xf32>,
    %79 = tpu.iota {dimensions = array<i32: 1>} : vector<1x128xi32>
    %c0_36 = arith.constant 0 : index
    %c0_37 = arith.constant 0 : index
    %c0_38 = arith.constant 0 : index
    %80 = vector.load %arg13[%c0_36, %c0_37, %c0_38] : memref<1x1x128xf32, #tpu.memory_space<vmem>>, vector<1x1x128xf32>
    %81 = vector.shape_cast %80 : vector<1x1x128xf32> to vector<1x128xf32>
    %c0_i32_39 = arith.constant 0 : i32
    %82 = vector.broadcast %c0_i32_39 : i32 to vector<1x128xi32>
    %83 = arith.cmpi eq, %79, %82 : vector<1x128xi32>
    %cst_40 = arith.constant 0.000000e+00 : f32
    %84 = vector.broadcast %52 : f32 to vector<1x128xf32>
    %85 = vector.broadcast %cst_40 : f32 to vector<1x128xf32>
    %86 = arith.select %83, %84, %85 : vector<1x128xi1>, vector<1x128xf32>
    %c1_i32 = arith.constant 1 : i32
    %87 = vector.broadcast %c1_i32 : i32 to vector<1x128xi32>
    %88 = arith.cmpi eq, %79, %87 : vector<1x128xi32>
    %cst_41 = arith.constant 0.000000e+00 : f32
    %89 = vector.broadcast %65 : f32 to vector<1x128xf32>
    %90 = vector.broadcast %cst_41 : f32 to vector<1x128xf32>
    %91 = arith.select %88, %89, %90 : vector<1x128xi1>, vector<1x128xf32>
    %92 = arith.addf %86, %91 : vector<1x128xf32>
    %93 = arith.addf %81, %92 : vector<1x128xf32>
    %c0_42 = arith.constant 0 : index
    %c0_43 = arith.constant 0 : index
    %c0_44 = arith.constant 0 : index
    %94 = vector.load %arg13[%c0_42, %c0_43, %c0_44] : memref<1x1x128xf32, #tpu.memory_space<vmem>>, vector<1x1x128xf32>
    %95 = vector.shape_cast %94 : vector<1x1x128xf32> to vector<1x128xf32>
    %96 = vector.shape_cast %93 : vector<1x128xf32> to vector<1x1x128xf32>
    tpu.vector_store %arg13[%c0_42, %c0_43, %c0_44], %96 {strides = array<i32>} : memref<1x1x128xf32, #tpu.memory_space<vmem>>, vector<1x1x128xf32>,
    %c0_i32_45 = arith.constant 0 : i32
    %97 = arith.cmpi eq, %arg1, %c0_i32_45 : i32
    %98 = arith.extui %97 : i1 to i32
    %c0_i32_46 = arith.constant 0 : i32
    %99 = arith.cmpi ne, %98, %c0_i32_46 : i32
    scf.if %99 {
      %c0_47 = arith.constant 0 : index
      %c0_48 = arith.constant 0 : index
      %100 = vector.load %arg14[%c0_47, %c0_48] : memref<1x32xf32, #tpu.memory_space<vmem>>, vector<1x32xf32>
      %101 = arith.truncf %100 : vector<1x32xf32> to vector<1x32xbf16>
      %c0_49 = arith.constant 0 : index
      %c0_50 = arith.constant 0 : index
      %102 = vector.load %arg9[%c0_49, %c0_50] : memref<32x128xbf16, #tpu.memory_space<vmem>>, vector<32x128xbf16>
      %cst_51 = arith.constant dense<0.000000e+00> : vector<1x128xf32>
      %103 = tpu.matmul %101, %102, %cst_51 {dimension_numbers = #tpu.dot_dimension_numbers<[1], [0], [0], [1], [0, 0, 1, 1], [], []>} : vector<1x32xbf16>, vector<32x128xbf16>, vector<1x128xf32> -> vector<1x128xf32>
      %c0_52 = arith.constant 0 : index
      %c0_53 = arith.constant 0 : index
      %104 = vector.load %arg10[%c0_52, %c0_53] : memref<1x128xf32, #tpu.memory_space<vmem>>, vector<1x128xf32>
      %105 = arith.addf %103, %104 : vector<1x128xf32>
      %c0_54 = arith.constant 0 : index
      %c0_55 = arith.constant 0 : index
      %c0_56 = arith.constant 0 : index
      %106 = vector.load %arg12[%c0_54, %c0_55, %c0_56] : memref<1x1x128xf32, #tpu.memory_space<vmem>>, vector<1x1x128xf32>
      %107 = vector.shape_cast %106 : vector<1x1x128xf32> to vector<1x128xf32>
      %108 = vector.shape_cast %105 : vector<1x128xf32> to vector<1x1x128xf32>
      tpu.vector_store %arg12[%c0_54, %c0_55, %c0_56], %108 {strides = array<i32>} : memref<1x1x128xf32, #tpu.memory_space<vmem>>, vector<1x1x128xf32>,
      %c3_i32 = arith.constant 3 : i32
      %109 = vector.broadcast %c3_i32 : i32 to vector<1x128xi32>
      %110 = arith.cmpi slt, %79, %109 : vector<1x128xi32>
      %cst_57 = arith.constant -1.000000e+30 : f32
      %111 = vector.broadcast %cst_57 : f32 to vector<1x128xf32>
      %112 = arith.select %110, %105, %111 : vector<1x128xi1>, vector<1x128xf32>
      %cst_58 = arith.constant dense<0xFF800000> : vector<1xf32>
      %113 = vector.multi_reduction <maximumf>, %112, %cst_58 [1] : vector<1x128xf32> to vector<1xf32>
      %114 = vector.shape_cast %113 : vector<1xf32> to vector<1x1xf32>
      %115 = vector.broadcast %114 : vector<1x1xf32> to vector<1x128xf32>
      %116 = arith.subf %112, %115 : vector<1x128xf32>
      %117 = math.exp %116 : vector<1x128xf32>
      %cst_59 = arith.constant dense<0.000000e+00> : vector<1xf32>
      %118 = vector.multi_reduction <add>, %117, %cst_59 [1] : vector<1x128xf32> to vector<1xf32>
      %119 = vector.shape_cast %118 : vector<1xf32> to vector<1x1xf32>
      %120 = math.log %119 : vector<1x1xf32>
      %121 = arith.addf %120, %114 : vector<1x1xf32>
      %122 = arith.index_cast %arg0 : i32 to index
      %123 = memref.load %arg2[%122] : memref<2xi32, #tpu.memory_space<smem>>
      %124 = vector.broadcast %123 : i32 to vector<1x128xi32>
      %125 = arith.cmpi eq, %79, %124 : vector<1x128xi32>
      %cst_60 = arith.constant 0.000000e+00 : f32
      %126 = vector.broadcast %cst_60 : f32 to vector<1x128xf32>
      %127 = arith.select %125, %105, %126 : vector<1x128xi1>, vector<1x128xf32>
      %cst_61 = arith.constant dense<0.000000e+00> : vector<1xf32>
      %128 = vector.multi_reduction <add>, %127, %cst_61 [1] : vector<1x128xf32> to vector<1xf32>
      %129 = vector.shape_cast %128 : vector<1xf32> to vector<1x1xf32>
      %c0_62 = arith.constant 0 : index
      %c0_63 = arith.constant 0 : index
      %c0_64 = arith.constant 0 : index
      %130 = vector.load %arg13[%c0_62, %c0_63, %c0_64] : memref<1x1x128xf32, #tpu.memory_space<vmem>>, vector<1x1x128xf32>
      %131 = vector.shape_cast %130 : vector<1x1x128xf32> to vector<1x128xf32>
      %c2_i32 = arith.constant 2 : i32
      %132 = vector.broadcast %c2_i32 : i32 to vector<1x128xi32>
      %133 = arith.cmpi eq, %79, %132 : vector<1x128xi32>
      %134 = arith.subf %121, %129 : vector<1x1xf32>
      %135 = vector.shape_cast %134 : vector<1x1xf32> to vector<1x1x1xf32>
      %cst_65 = arith.constant dense<0.000000e+00> : vector<1xf32>
      %136 = vector.multi_reduction <add>, %135, %cst_65 [1, 2] : vector<1x1x1xf32> to vector<1xf32>
      %137 = vector.shape_cast %136 : vector<1xf32> to vector<1x1x1xf32>
      %138 = vector.extract %137[0, 0, 0] : f32 from vector<1x1x1xf32>
      %cst_66 = arith.constant 0.000000e+00 : f32
      %139 = vector.broadcast %138 : f32 to vector<1x128xf32>
      %140 = vector.broadcast %cst_66 : f32 to vector<1x128xf32>
      %141 = arith.select %133, %139, %140 : vector<1x128xi1>, vector<1x128xf32>
      %142 = arith.addf %131, %141 : vector<1x128xf32>
      %c0_67 = arith.constant 0 : index
      %c0_68 = arith.constant 0 : index
      %c0_69 = arith.constant 0 : index
      %143 = vector.load %arg13[%c0_67, %c0_68, %c0_69] : memref<1x1x128xf32, #tpu.memory_space<vmem>>, vector<1x1x128xf32>
      %144 = vector.shape_cast %143 : vector<1x1x128xf32> to vector<1x128xf32>
      %145 = vector.shape_cast %142 : vector<1x128xf32> to vector<1x1x128xf32>
      tpu.vector_store %arg13[%c0_67, %c0_68, %c0_69], %145 {strides = array<i32>} : memref<1x1x128xf32, #tpu.memory_space<vmem>>, vector<1x1x128xf32>,
    } else {
    }
    return
  }
  func.func @transform_0(%arg0: i32, %arg1: i32, %arg2: memref<2xi32, #tpu.memory_space<smem>>) -> (i32, i32, i32) {
    %c0_i32 = arith.constant 0 : i32
    %c0_i32_0 = arith.constant 0 : i32
    return %arg0, %arg1, %c0_i32 : i32, i32, i32
  }
  func.func @transform_1(%arg0: i32, %arg1: i32, %arg2: memref<2xi32, #tpu.memory_space<smem>>) -> (i32, i32, i32) {
    %c0_i32 = arith.constant 0 : i32
    %c0_i32_0 = arith.constant 0 : i32
    return %arg0, %arg1, %c0_i32 : i32, i32, i32
  }
  func.func @transform_2(%arg0: i32, %arg1: i32, %arg2: memref<2xi32, #tpu.memory_space<smem>>) -> (i32, i32, i32) {
    %c0_i32 = arith.constant 0 : i32
    %c0_i32_0 = arith.constant 0 : i32
    return %arg0, %arg1, %c0_i32 : i32, i32, i32
  }
  func.func @transform_3(%arg0: i32, %arg1: i32, %arg2: memref<2xi32, #tpu.memory_space<smem>>) -> (i32, i32, i32) {
    %c0_i32 = arith.constant 0 : i32
    %c0_i32_0 = arith.constant 0 : i32
    return %arg0, %arg1, %c0_i32 : i32, i32, i32
  }
  func.func @transform_4(%arg0: i32, %arg1: i32, %arg2: memref<2xi32, #tpu.memory_space<smem>>) -> (i32, i32) {
    %c0_i32 = arith.constant 0 : i32
    %c0_i32_0 = arith.constant 0 : i32
    %c0_i32_1 = arith.constant 0 : i32
    return %c0_i32, %c0_i32_0 : i32, i32
  }
  func.func @transform_5(%arg0: i32, %arg1: i32, %arg2: memref<2xi32, #tpu.memory_space<smem>>) -> (i32, i32) {
    %c0_i32 = arith.constant 0 : i32
    %c0_i32_0 = arith.constant 0 : i32
    %c0_i32_1 = arith.constant 0 : i32
    return %c0_i32, %c0_i32_0 : i32, i32
  }
  func.func @transform_6(%arg0: i32, %arg1: i32, %arg2: memref<2xi32, #tpu.memory_space<smem>>) -> (i32, i32) {
    %c0_i32 = arith.constant 0 : i32
    %c0_i32_0 = arith.constant 0 : i32
    %c0_i32_1 = arith.constant 0 : i32
    return %c0_i32, %c0_i32_0 : i32, i32
  }
  func.func @transform_7(%arg0: i32, %arg1: i32, %arg2: memref<2xi32, #tpu.memory_space<smem>>) -> (i32, i32) {
    %c0_i32 = arith.constant 0 : i32
    %c0_i32_0 = arith.constant 0 : i32
    %c0_i32_1 = arith.constant 0 : i32
    return %c0_i32, %c0_i32_0 : i32, i32
  }
  func.func @transform_8(%arg0: i32, %arg1: i32, %arg2: memref<2xi32, #tpu.memory_space<smem>>) -> (i32, i32, i32) {
    %c0_i32 = arith.constant 0 : i32
    %c0_i32_0 = arith.constant 0 : i32
    return %arg0, %arg1, %c0_i32 : i32, i32, i32
  }
  func.func @transform_9(%arg0: i32, %arg1: i32, %arg2: memref<2xi32, #tpu.memory_space<smem>>) -> (i32, i32, i32) {
    %c0_i32 = arith.constant 0 : i32
    %c0_i32_0 = arith.constant 0 : i32
    %c0_i32_1 = arith.constant 0 : i32
    return %arg0, %c0_i32, %c0_i32_0 : i32, i32, i32
  }
  func.func @transform_10(%arg0: i32, %arg1: i32, %arg2: memref<2xi32, #tpu.memory_space<smem>>) -> (i32, i32, i32) {
    %c0_i32 = arith.constant 0 : i32
    %c0_i32_0 = arith.constant 0 : i32
    %c0_i32_1 = arith.constant 0 : i32
    return %arg0, %c0_i32, %c0_i32_0 : i32, i32, i32
  }
}

</mosaic_0001>

<bundles_post_ra>
// kernel: bert_gnn_decoder_forward.1
= control target key start
LH: loop header
LB: loop body
LE: loop exit
PB: predicated region body
PF: predicated region fallthrough
CT: control target
= control target key end

     0   :  { %s1424_s0 = inlined_call_operand.vmem [shape: s32[2], index: 0, kind: input, shape index: {}]   ;;  %s1425_s1 = inlined_call_operand.vmem [shape: f32[2,8,32], index: 1, kind: input, shape index: {}]   ;;  %s1426_s2 = inlined_call_operand.vmem [shape: f32[2,8,32], index: 2, kind: input, shape index: {}]   ;;  %s1427_s3 = inlined_call_operand.vmem [shape: s32[2,8,1], index: 3, kind: input, shape index: {}]   ;;  %s1428_s4 = inlined_call_operand.vmem [shape: f32[2,8,4], index: 4, kind: input, shape index: {}]   ;;  %s1429_s5 = inlined_call_operand.vmem [shape: bf16[32,128], index: 5, kind: input, shape index: {}]   ;;  %s1430_s6 = inlined_call_operand.vmem [shape: f32[1,128], index: 6, kind: input, shape index: {}]   ;;  %s1431_s7 = inlined_call_operand.vmem [shape: bf16[32,128], index: 7, kind: input, shape index: {}]   ;;  %s1432_s8 = inlined_call_operand.vmem [shape: f32[1,128], index: 8, kind: input, shape index: {}]   ;;  %s1433_s9 = inlined_call_operand.vmem [shape: f32[2,8,128], index: 9, kind: output, shape index: {0}]   ;;  %s1434_s10 = inlined_call_operand.hbm [shape: f32[2,1,128], index: 10, kind: output, shape index: {1}]   ;;  %s1435_s11 = inlined_call_operand.vmem [shape: f32[2,1,128], index: 11, kind: output, shape index: {2}]  }
   0x1   :  { %1437 = sst [smem:[#allocation9_spill]] %s1425_s1  ;;  %s17_s19 = sshll.u32 %s1424_s0, 4  ;;  %s18_s19 = int_to_ptr.vmem [resolvable:$true] %s17_s19 }
   0x2   :  { %1438 = sst [smem:[#allocation10_spill]] %s1426_s2  ;;  %s1066_s20 = scalar_lea.vmem %s18_s19, 16 }
   0x3   :  { %1439 = sst [smem:[#allocation11_spill]] %s1427_s3  ;;  %p1067_p0 = scmp.ne.s32.totalorder %s18_s19, %s1066_s20 }
   0x4   :  { %p1071_p1 = scmp.lt.s32.totalorder %s18_s19, %s18_s19  ;;  %p1072_p2 = scmp.lt.s32.totalorder %s1066_s20, %s1066_s20 }
   0x6   :  { %p1073_p3 = por %p1072_p2, %p1071_p1 }
   0x8   :  { %p1074_p4 = pnand %p1073_p3, %p1067_p0 }
   0xa   :  { %1077 = shalt.err (!%p1074_p4)  }
   0xb   :  { %s1160_s21 = smov [#allocation4]  }
   0xc   :  { %20 = dma.vmem_to_smem %s18_s19, 16, %s1160_s21, [#allocation3] }
   0xd   :  { %1130 = dma.done.wait [#allocation3], 16 }
   0xe   :  { %1131 = vsyncadd [#allocation3], 4294967280 }
   0xf   :  { %22 = sfence }
  0x10   :  { %23 = vsyncpa [#allocation6], 0 }
  0x11   :  { %25 = vsyncpa [#allocation6 + $0x1], 0  ;;  %s1229_s22 = smov 0   ;;  %s1231_s23 = smov 0  }
  0x12   :  { %s1233_s0 = smov 0   ;;  %s1235_s24 = smov 0  }
  0x13   :  { %s1237_s25 = smov 0   ;;  %s1239_s26 = smov 0  }
  0x14 LB: > { %s945_s27 = sadd.s32 4294967295, %s1158_s26   ;;  %s946_s28 = sadd.s32 4294967294, %s1158_s26   ;;  %s1158_s26 = sphi %s1239_s26, %s31_s26   ;;  %s1154_s25 = sphi %s1237_s25, %s1450_s25   ;;  %s1150_s24 = sphi %s1235_s24, %s1449_s24   ;;  %s1146_s0 = sphi %s1233_s0, %s1448_s0   ;;  %s1142_s23 = sphi %s1231_s23, %s1447_s23   ;;  %s1138_s22 = sphi %s1229_s22, %s1446_s22  }
  0x15   : > { %s43_s29 = sadd.s32 1, %s1154_s25  ;;  %s274_s30 = sadd.s32 1, %s1146_s0 }
  0x16   : > { %p45_p5 = scmp.ge.s32.totalorder %s43_s29, 2  ;;  %p284_p6 = scmp.ne.s32.totalorder %s1146_s0, %s1142_s23 }
  0x17   : > { %p285_p7 = scmp.eq.s32.totalorder %s945_s27, 1  ;;  %p290_p8 = scmp.ne.s32.totalorder %s1142_s23, %s1138_s22 }
  0x18   : > { %s1452_s29 = smov (%p45_p5, %s43_s29), 0  ;;  %p291_p10 = scmp.eq.s32.totalorder %s946_s28, 1 }
  0x19   : > { %p1269_p9 = por %p285_p7, %p284_p6  ;;  %s271_s13 = ssub.s32 %s1154_s25, %s1452_s29 }
  0x1a   : > { %p949_p11 = scmp.ge.s32.totalorder %s1158_s26, 1  ;;  %p272_p12 = scmp.eq.s32.totalorder %s271_s13, 0 }
  0x1b   : > { %p1276_p13 = por %p291_p10, %p290_p8  ;;  %p387_p0 = scmp.lt.s32.totalorder %s1158_s26, 3 }
  0x1c   : > { %s1282_s15 = scalar_select %p272_p12, %s1146_s0, %s274_s30  }
  0x1d   : > { %p388_p1 = pnand %p949_p11, %p387_p0 }
  0x1e   : > { %v1054_v0 = vld [vmem:[%s1429_s5] sm:$0xff] (!%p388_p1)   ;;  %v1161_v1 = vmov (!%p388_p1), 0.0   ;;  %v1055_v2 = vld [vmem:[%s1429_s5 + $0x8] sm:$0xff] (!%p388_p1)   ;;  %vm1162_vm0 = vmmov (!%p388_p1), 0   ;;  %p457_p2 = scmp.lt.s32.totalorder (!%p388_p1), %s1150_s24, 1  ;;  %vm641_vm1 = vcmask (!%p388_p1), 253952   ;;  %v573_v22 = vlaneseq (!%p388_p1) }
  0x1f   : > { %391 = sbr.rel (%p388_p1) target bundleno = 802 (0x322), region = 52  ;;  %971 = vmatprep.subr.bf16.mxu0 (!%p388_p1), %v1161_v1  ;;  %979 = vmatprep.subr.bf16.mxu1 (!%p388_p1), %v1161_v1  ;;  %v1056_v3 = vld [vmem:[%s1431_s7] sm:$0xff] (!%p388_p1)   ;;  %v1163_v4 = vmov (!%p388_p1), -1e+30   ;;  %v1057_v5 = vld [vmem:[%s1431_s7 + $0x8] sm:$0xff] (!%p388_p1)   ;;  %s1442_s1 = sld [smem:[#allocation9_spill]] (!%p388_p1) }
  0x20   : > { %972 = vmatpush3.bf16.msra.mxu0 (!%p388_p1), %v1054_v0  ;;  %975 = vmatprep.mubr.msk.bf16.mxu0 (!%p388_p1), %vm1162_vm0, %v1161_v1  ;;  %642 = vst.msk [vmem:[#allocation2] sm:$0x1] (!%p388_p1), %vm641_vm1, %v1163_v4  ;;  %s1443_s2 = sld [smem:[#allocation10_spill]] (!%p388_p1)  ;;  %vm528_vm2 = vcmask (!%p388_p1), 261120   ;;  %v1164_v21 = vmov (!%p388_p1), 0   ;;  %v1322_v23 = vand.u32 (!%p388_p1), 127, %v573_v22 }
  0x21   : > { %973 = vmatprep.subr.bf16.mxu0 (!%p388_p1), %v1161_v1  ;;  %983 = vmatprep.mubr.msk.bf16.mxu1 (!%p388_p1), %vm1162_vm0, %v1161_v1  ;;  %v955_v24 = vld [vmem:[%s1430_s6] ss:$0 sm:$0xff] (!%p388_p1)  ;;  %s1444_s3 = sld [smem:[#allocation11_spill]] (!%p388_p1)  ;;  %s1436_s16 = sand.u32 (!%p388_p1), 1, %s1142_s23   ;;  %vm726_vm7 = vcmask (!%p388_p1), 1040384   ;;  %vm600_vm9 = vcmask (!%p388_p1), 7168  }
  0x22   : > { %980 = vmatpush3.bf16.msra.mxu1 (!%p388_p1), %v1056_v3  ;;  %1053 = vset.pattern.permute.xlu0 (!%p388_p1), %v1164_v21  ;;  %vm575_vm3 = vcmp.ge.s32.totalorder (!%p388_p1), %v1322_v23, 4  ;;  %vm576_vm4 = vcmp.lt.s32.totalorder (!%p388_p1), %v1322_v23, 24  ;;  %v667_v37 = vld [vmem:[%s1432_s8] sm:$0x1] (!%p388_p1)  ;;  %s1343_s17 = scalar_lea.vmem (!%p388_p1), [#allocation5], %s1436_s16  ;;  %vm724_vm6 = vcmp.lt.s32.totalorder (!%p388_p1), %v1322_v23, 3 }
  0x23   : > { %981 = vmatprep.subr.bf16.mxu1 (!%p388_p1), %v1161_v1  ;;  %vm577_vm5 = vmand (!%p388_p1), %vm575_vm3, %vm576_vm4  ;;  %vm617_vm10 = vcmask (!%p388_p1), 31744   ;;  %s781_s19 = sshll.u32 (!%p388_p1), %s1343_s17, 4  ;;  %s782_s19 = int_to_ptr.vmem [resolvable:$true] %s781_s19 }
  0x24   : > { %974 = vmatpush3.bf16.msra.mxu0 (!%p388_p1), %v1055_v2 }
  0x26   : > { %s1301_s27 = scalar_select %p457_p2, %s1150_s24, 1  ;;  %982 = vmatpush3.bf16.msra.mxu1 %v1057_v5 }
  0x27   : > { %v644_v16 = vld [vmem:[#allocation2] sm:$0x1] }
  0x28   : > { %s1308_s13 = sshll.u32 %s1301_s27, 3  ;;  %s1364_s30 = scalar_lea.vmem %s1435_s11, %s1301_s27 }
  0x29   : > { %s463_s18 = scalar_lea.vmem %s1442_s1, %s1308_s13  ;;  %s470_s21 = scalar_lea.vmem %s1443_s2, %s1308_s13  ;;  %643 = vst [vmem:[%s1364_s30] sm:$0x1] %v1161_v1 }
  0x2a   : > { %v496_v6 = vld [vmem:[%s463_s18] sm:$0xff]  ;;  %s491_s18 = scalar_lea.vmem %s1433_s9, %s1308_s13  ;;  %s484_s20 = scalar_lea.vmem %s1428_s4, %s1308_s13 }
  0x2b   : > { %v497_v7 = vld [vmem:[%s470_s21] sm:$0xff]  ;;  %v504_v8 = vpack.c.bf16 %v496_v6, %v496_v6  ;;  %s477_s21 = scalar_lea.vmem %s1444_s3, %s1308_s13  ;;  %s1445_s1 = sand.u32 1, %s1142_s23  }
  0x2c   : > { %v628_v9 = vsub.f32 %v497_v7, %v496_v6  ;;  %v589_v31 = vld [vmem:[%s477_s21] sm:$0xff]  ;;  %s739_s21 = sld [smem:[#allocation4 + %s1150_s24]]  ;;  %s763_s2 = scalar_lea.sflag [#allocation6], %s1445_s1 }
  0x2d   : > { %976 = vmatmul.mubr.msk.bf16.vlgmr.msra.gmra.mrb[0].mxu0 %vm528_vm2, %v504_v8  ;;  %v590_v32 = vadd.s32 4, %v589_v31  ;;  %v611_v52 = vld [vmem:[%s484_s20] sm:$0xff]  ;;  %s1078_s3 = scalar_lea.vmem %s782_s19, 16  ;;  %s1165_s27 = smov [#allocation5]  }
  0x2e   : > { %v630_v10 = vsel %vm528_vm2, %v628_v9, -inf  ;;  %p1079_p3 = scmp.ne.s32.totalorder %s782_s19, %s1078_s3  ;;  %s1082_s13 = sshll.u32 %s1165_s27, 4  ;;  %s1083_s13 = int_to_ptr.vmem [resolvable:$false] %s1082_s13 }
  0x2f   : > { %v631_v11 = vrot.slane %v630_v10, 4  ;;  %s1084_s28 = scalar_lea.vmem %s1083_s13, 32  ;;  %p1085_p6 = scmp.lt.s32.totalorder %s782_s19, %s1083_s13 }
  0x30   : > { %p1080_p4 = pnand %p1079_p3, %p1269_p9  ;;  %p1086_p7 = scmp.lt.s32.totalorder %s1084_s28, %s1078_s3 }
  0x31   : > { %v632_v12 = vmax.f32 %v630_v10, %v631_v11 }
  0x32   : > { %v740_v60 = vstv %s739_s21  ;;  %p1081_p5 = pneg %p1080_p4  ;;  %p1087_p8 = por %p1086_p7, %p1085_p6 }
  0x33   : > { %v633_v13 = vrot.slane %v632_v12, 2  ;;  %vm741_vm11 = vcmp.eq.s32.totalorder %v1322_v23, %v740_v60 }
  0x34   : > { %p1088_p10 = pnand %p1087_p8, %p1081_p5 }
  0x35   : > { %v634_v14 = vmax.f32 %v632_v12, %v633_v13 }
  0x37   : > { %v635_v15 = vrot.slane %v634_v14, 1 }
  0x39   : > { %v636_v17 = vmax.f32 %v634_v14, %v635_v15 }
  0x3b   : > { %v645_v18 = vmax.f32 %v644_v16, %v636_v17 }
  0x3d   : > { %647 = vst.msk [vmem:[#allocation2] sm:$0x1] %vm641_vm1, %v645_v18 }
  0x44   : > { %v661_v19 = vld [vmem:[#allocation2] sm:$0x1] }
  0x45   : > { %v662_v20 = vpack.c.bf16 %v661_v19, %v661_v19 }
  0x47   : > { %984 = vmatmul.mubr.msk.bf16.vlgmr.msra.gmra.mrb[0].mxu1 %vm528_vm2, %v662_v20 }
 0x100   : > { %v566_v25 = vpop.f32.mrb[0].mxu0 }
 0x101   : > { %v567_v26 = vadd.f32 %v955_v24, %v566_v25  ;;  %v977_v27 = vpop.f32.mrb[1].mxu0 }
 0x102   : > { %v569_v28 = vpop.f32.mrb[2].mxu0 }
 0x103   : > { %572 = vst [vmem:[%s491_s18] sm:$0xff] %v567_v26  ;;  %v978_v29 = vpop.f32.mrb[3].mxu0  ;;  %v578_v30 = vsel %vm577_vm5, %v567_v26, -1e+30  ;;  %v612_v55 = vsub.f32 %v567_v26, %v611_v52  ;;  %s962_s18 = sshll.u32 %s1150_s24, 4 }
 0x104   : > { %579 = vmax.xlane.f32.xlu0 %v578_v30  ;;  %s1373_s16 = scalar_lea.hbm %s1434_s10, %s962_s18 }
 0x105   : > { %v616_v59 = vmul.f32 %v612_v55, %v612_v55 }
 0x107   : > { %v618_v61 = vsel %vm617_vm10, %v616_v59, 0.0 }
 0x11a   : > { %592 = vperm.xlu0 %1053, %v590_v32   ;;  %v717_v33 = vpop.f32.mrb[0].mxu1 }
 0x11b   : > { %v985_v34 = vpop.f32.mrb[1].mxu1  ;;  %v718_v38 = vadd.f32 %v717_v33, %v667_v37 }
 0x11c   : > { %v720_v35 = vpop.f32.mrb[2].mxu1 }
 0x11d   : > { %v986_v36 = vpop.f32.mrb[3].mxu1  ;;  %723 = vst [vmem:[%s1343_s17] sm:$0x1] %v718_v38  ;;  %v725_v42 = vsel %vm724_vm6, %v718_v38, -1e+30  ;;  %v742_v0 = vsel %vm741_vm11, %v718_v38, 0.0 }
 0x11e   : > { %v727_v45 = vsel %vm726_vm7, %v725_v42, -inf  ;;  %v743_v2 = vsel %vm726_vm7, %v742_v0, 0.0 }
 0x191   : > { %v580_v39 = vpop.xlane.xlu0 %579 }
 0x192   : > { %v581_v40 = vsub.f32 %v578_v30, %v580_v39 }
 0x194   : > { %v582_v41 = vmul.f32 1.442695, %v581_v40 }
 0x196   : > { %1058 = vpow2.f32 %v582_v41 }
 0x199   : > { %v593_v44 = vpop.permute.xlu0 %592 }
 0x19a   : > { %vm594_vm8 = vcmp.eq.s32.totalorder %v1322_v23, %v593_v44 }
 0x19b   : > { %v595_v46 = vsel %vm594_vm8, %v567_v26, 0.0 }
 0x1a0   : > { %v1059_v43 = vpop.eup %1058 }
 0x1a1   : > { %584 = vadd.xlane.f32.xlu1 %v1059_v43 }
 0x1a5   : > { %728 = vmax.xlane.f32.xlu1 %v727_v45 }
 0x1a9   : > { %596 = vadd.xlane.f32.xlu1 %v595_v46 }
 0x22e   : > { %v585_v47 = vpop.xlane.xlu1 %584 }
 0x22f   : > { %1060 = vlog2.f32 %v585_v47 }
 0x232   : > { %v1349_v48 = vpop.xlane.xlu1 %728 }
 0x233   : > { %v730_v49 = vsub.f32 %v725_v42, %v1349_v48 }
 0x235   : > { %v731_v50 = vmul.f32 1.442695, %v730_v49 }
 0x236   : > { %v597_v56 = vpop.xlane.xlu1 %596 }
 0x237   : > { %1062 = vpow2.f32 %v731_v50 }
 0x239   : > { %v1061_v51 = vpop.eup %1060 }
 0x23a   : > { %v587_v53 = vmul.f32 0.6931472, %v1061_v51 }
 0x23c   : > { %v588_v54 = vadd.f32 %v587_v53, %v580_v39 }
 0x23e   : > { %v598_v57 = vsub.f32 %v588_v54, %v597_v56 }
 0x240   : > { %v601_v58 = vsel %vm600_vm9, %v598_v57, 0.0 }
 0x241   : > { %602 = vadd.xlane.f32.xlu1 %v601_v58  ;;  %v1063_v62 = vpop.eup %1062 }
 0x242   : > { %v733_v63 = vsel %vm726_vm7, %v1063_v62, 0.0 }
 0x245   : > { %619 = vadd.xlane.f32.xlu1 %v618_v61 }
 0x249   : > { %734 = vadd.xlane.f32.xlu1 %v733_v63 }
 0x24d   : > { %744 = vadd.xlane.f32.xlu1 %v743_v2 }
 0x24e   : > { %1091 = shalt.err (!%p1088_p10)
}
 0x24f   : > { %s1092_s1 = scalar_lea.hbm %s1373_s16, 16  ;;  %s1096_s18 = scalar_lea.hbm %s1434_s10, 32 }
 0x250   : > { %p1093_p11 = scmp.ne.s32.totalorder %s1373_s16, %s1092_s1  ;;  %p1097_p1 = scmp.lt.u32.totalorder %s1373_s16, %s1434_s10 }
 0x251   : > { %p1098_p2 = scmp.lt.u32.totalorder %s1096_s18, %s1092_s1  ;;  %p1100_p4 = scmp.lt.u32.totalorder %s1092_s1, %s1373_s16 }
 0x252   : > { %p1094_p12 = pnand %p1093_p11, %p1269_p9 }
 0x253   : > { %p1099_p3 = por %p1098_p2, %p1097_p1 }
 0x254   : > { %p1095_p0 = pneg %p1094_p12 }
 0x255   : > { %p1101_p5 = por %p1100_p4, %p1099_p3 }
 0x257   : > { %p1102_p6 = pnand %p1101_p5, %p1095_p0 }
 0x259   : > { %1105 = shalt.err (!%p1102_p6)
}
 0x25a   : > { %993 = dma.vmem_to_hbm [thread:$0]  (%p1269_p9), %s782_s19, 16, %s1373_s16, %s763_s2   ;;  %vm649_vm12 = vcmp.eq.s32.totalorder %v1322_v23, 0  ;;  %vm652_vm13 = vcmp.eq.s32.totalorder %v1322_v23, 1  ;;  %v648_v26 = vld [vmem:[%s1364_s30] sm:$0x1]  ;;  %vm747_vm14 = vcmp.eq.s32.totalorder %v1322_v23, 2 }
 0x2ce   : > { %v603_v1 = vpop.xlane.xlu1 %602 }
 0x2cf   : > { %v604_v3 = vrot.slane %v603_v1, 4 }
 0x2d1   : > { %v605_v4 = vadd.f32 %v604_v3, %v603_v1 }
 0x2d2   : > { %v620_v5 = vpop.xlane.xlu1 %619 }
 0x2d3   : > { %v606_v6 = vrot.slane %v605_v4, 2  ;;  %v621_v7 = vrot.slane %v620_v5, 4 }
 0x2d5   : > { %v622_v8 = vadd.f32 %v621_v7, %v620_v5  ;;  %v607_v9 = vadd.f32 %v606_v6, %v605_v4 }
 0x2d6   : > { %v735_v10 = vpop.xlane.xlu1 %734 }
 0x2d7   : > { %v623_v11 = vrot.slane %v622_v8, 2  ;;  %1064 = vlog2.f32 %v735_v10  ;;  %v608_v12 = vrot.slane %v607_v9, 1 }
 0x2d9   : > { %v609_v13 = vadd.f32 %v608_v12, %v607_v9  ;;  %v624_v14 = vadd.f32 %v623_v11, %v622_v8 }
 0x2da   : > { %v745_v20 = vpop.xlane.xlu1 %744 }
 0x2db   : > { %987 = vpush %v609_v13  ;;  %v625_v15 = vrot.slane %v624_v14, 1 }
 0x2dd   : > { %v626_v16 = vadd.f32 %v625_v15, %v624_v14 }
 0x2df   : > { %989 = vpush %v626_v16 }
 0x2e1   : > { %v1065_v17 = vpop.eup %1064 }
 0x2e2   : > { %v737_v18 = vmul.f32 0.6931472, %v1065_v17 }
 0x2e4   : > { %v738_v19 = vadd.f32 %v737_v18, %v1349_v48 }
 0x2e6   : > { %v748_v21 = vsub.f32 %v738_v19, %v745_v20 }
 0x2e8   : > { %991 = vpush %v748_v21 }
 0x30c   : > { %s988_s2 = spop %987 }
 0x30d   : > { %v650_v22 = vstv %s988_s2 }
 0x30e   : > { %v651_v25 = vsel %vm649_vm12, %v650_v22, 0.0 }
 0x310   : > { %s990_s3 = spop %989 }
 0x311   : > { %v653_v24 = vstv %s990_s3 }
 0x312   : > { %v654_v27 = vsel %vm652_vm13, %v653_v24, 0.0 }
 0x313   : > { %v655_v28 = vadd.f32 %v654_v27, %v651_v25 }
 0x315   : > { %v656_v29 = vadd.f32 %v655_v28, %v648_v26 }
 0x317   : > { %657 = vst [vmem:[%s1364_s30] sm:$0x1] %v656_v29 }
 0x319   : > { %s992_s12 = spop %991 }
 0x31a   : > { %v751_v30 = vstv %s992_s12 }
 0x31b   : > { %v752_v32 = vsel %vm747_vm14, %v751_v30, 0.0 }
 0x31e   : > { %v746_v31 = vld [vmem:[%s1364_s30] sm:$0x1] }
 0x31f   : > { %v753_v33 = vadd.f32 %v752_v32, %v746_v31 }
 0x321   : > { %754 = vst [vmem:[%s1364_s30] sm:$0x1] %v753_v33 }
 0x322 PF: > { %p999_p9 = scmp.ge.s32.totalorder %s1158_s26, 2  ;;  %s806_s16 = sand.u32 1, %s1138_s22  }
 0x323   : > { %s807_s19 = scalar_lea.sflag [#allocation6], %s806_s16 }
 0x324   : > { %p996_p7 = pnand %p999_p9, %p1276_p13 }
 0x326   : > { %1133 = dma.done.wait (!%p996_p7), %s807_s19, 16  }
 0x327   : > { %1135 = vsyncadd (!%p996_p7), %s807_s19, 4294967280  ;;  %s31_s26 = sadd.s32 1, %s1158_s26   ;;  %s1446_s22 = smov %s1142_s23 }
 0x328   : > { %p28_p8 = scmp.ge.s32.totalorder %s31_s26, 4   ;;  %s1447_s23 = smov %s1146_s0 }
 0x329   : > { %s1448_s0 = smov %s1282_s15  ;;  %s1449_s24 = smov %s1154_s25 }
 0x32a   : > { %s1450_s25 = smov %s1452_s29  ;;  %30 = sbr.rel (!%p28_p8) target bundleno = 20 (0x14), region = 128 }
 0x331   :  { %817 = vsyncpa [#allocation6], 1 }
 0x332   :  { %819 = vsyncpa [#allocation6 + $0x1], 1 }

</bundles_post_ra>
